<compile_context>
chip_gen: v7x
topology: tpu7x:2x2x1
jax: 0.10.0
libtpu: 0.0.40
codegen_flags: <defaults>
</compile_context>

<pallas_src>
import functools

import jax
import jax.numpy as jnp
from jax.experimental import pallas as pl
from jax.experimental.pallas import tpu as pltpu


def _cdiv(a: int, b: int) -> int:
    return -(-a // b)


def _round_up(x: int, m: int) -> int:
    return _cdiv(x, m) * m


def _trim_kernel(x_hbm, o_ref, *scratch_refs, top, left, p_blk, h_blk,
                 out_w, out_h, n_planes, num_pb, num_hb, narrow):
    """One grid step: move the cropped window of up to p_blk planes x h_blk
    rows from HBM into the pipelined VMEM output block.

    wide rows   -> one strided DMA straight into o_ref (zero vector work)
    narrow rows -> one contiguous full-width DMA into VMEM scratch, then a
                   static lane-slice copy (avoids tiny strided HBM bursts)
    Ragged last blocks (plane / row axis) use static-size pl.when branches so
    every DMA shape is static and in bounds.
    """
    if narrow:
        xbuf, sem = scratch_refs
    else:
        (sem,) = scratch_refs

    pb = pl.program_id(0)
    hb = pl.program_id(1)

    def do_block(planes, rows):
        src_p = pl.ds(pb * p_blk, planes)
        src_r = pl.ds(top + hb * h_blk, rows)
        if narrow:
            cp = pltpu.make_async_copy(
                x_hbm.at[src_p, src_r, :],
                xbuf.at[pl.ds(0, planes), pl.ds(0, rows), :],
                sem)
            cp.start()
            cp.wait()
            o_ref[pl.ds(0, planes), pl.ds(0, rows), :] = (
                xbuf[pl.ds(0, planes), pl.ds(0, rows), pl.ds(left, out_w)])
        else:
            cp = pltpu.make_async_copy(
                x_hbm.at[src_p, src_r, pl.ds(left, out_w)],
                o_ref.at[pl.ds(0, planes), pl.ds(0, rows), :],
                sem)
            cp.start()
            cp.wait()

    p_tail = n_planes - (num_pb - 1) * p_blk
    h_tail = out_h - (num_hb - 1) * h_blk
    plane_cases = ([(p_blk, None)] if p_tail == p_blk
                   else [(p_blk, False), (p_tail, True)])
    row_cases = ([(h_blk, None)] if h_tail == h_blk
                 else [(h_blk, False), (h_tail, True)])

    for planes, p_last in plane_cases:
        for rows, h_last in row_cases:
            conds = []
            if p_last is not None:
                conds.append(pb == num_pb - 1 if p_last else pb < num_pb - 1)
            if h_last is not None:
                conds.append(hb == num_hb - 1 if h_last else hb < num_hb - 1)
            if not conds:
                do_block(planes, rows)
            else:
                cond = conds[0]
                for extra in conds[1:]:
                    cond = jnp.logical_and(cond, extra)
                pl.when(cond)(functools.partial(do_block, planes, rows))


def _choose_blocks(n_planes, out_h, sublane, row_bytes, budget):
    """Pick (p_blk, h_blk, num_pb, num_hb): largest blocks that fit the VMEM
    budget while exposing at least 2 grid steps (4-8 for larger crops) so the
    input DMA of step i overlaps the output writeback of step i-1."""
    plane_bytes = _round_up(out_h, sublane) * row_bytes
    total_bytes = n_planes * plane_bytes
    if total_bytes >= 8 * budget:
        target_steps = 8
    elif total_bytes >= 256 * 1024:
        target_steps = 4
    else:
        target_steps = 2

    if plane_bytes <= budget:
        # Whole cropped planes fit: split planes first, rows only if needed.
        p_blk = min(n_planes, max(1, budget // plane_bytes))
        h_blk = out_h
        num_pb = _cdiv(n_planes, p_blk)
        num_hb = 1
        if num_pb * num_hb < target_steps:
            num_pb = min(n_planes, target_steps)
            p_blk = _cdiv(n_planes, num_pb)
            num_pb = _cdiv(n_planes, p_blk)
            if num_pb < target_steps and out_h > sublane:
                want_hb = _cdiv(target_steps, num_pb)
                h_blk = _round_up(_cdiv(out_h, want_hb), sublane)
                if h_blk >= out_h:
                    h_blk = out_h
                num_hb = _cdiv(out_h, h_blk)
    else:
        # A single cropped plane exceeds the budget: one plane per step,
        # sublane-aligned, budget-capped row tiles (ragged tail allowed).
        p_blk = 1
        num_pb = n_planes
        rows = max(sublane, (budget // row_bytes) // sublane * sublane)
        h_blk = rows if rows < out_h else out_h
        num_hb = _cdiv(out_h, h_blk)
    return p_blk, h_blk, num_pb, num_hb


def trim_border(img: jax.Array, border_size: int,
                *, vmem_block_budget_bytes: int = 8 * 1024 * 1024) -> jax.Array:
    """img: (N, C, H, W) -> (N, C, max(0, H-2b), max(0, W-2b))."""
    n, c, h, w = img.shape

    if border_size == 0:
        return img                      # identity fast path: no HBM round trip
    if border_size < 0:
        # TODO(synk): torchvision F.crop zero-pads out-of-bounds windows for
        # negative border sizes; that padded path is not implemented here.
        raise NotImplementedError("negative border_size (padded crop) not supported")

    top = min(border_size, h)
    left = min(border_size, h)          # replicate timm's clamp of `left` against H
    out_h = max(0, h - 2 * border_size)
    out_w = max(0, w - 2 * border_size)
    if out_h == 0 or out_w == 0:
        return jnp.zeros((n, c, out_h, out_w), dtype=img.dtype)

    # For border_size > 0 and a non-degenerate output this is always a plain
    # in-bounds crop (the padded torchvision path only triggers for b < 0).
    assert top >= 0 and left >= 0 and top + out_h <= h and left + out_w <= w

    itemsize = jnp.dtype(img.dtype).itemsize
    n_planes = n * c
    sublane = max(8, 32 // itemsize)          # 8 (f32) / 16 (bf16) / 32 (int8)

    # Narrow crops -> full-width contiguous DMA + in-VMEM lane trim instead of
    # many tiny strided HBM bursts (only when the extra read stays cheap).
    narrow = (out_w * itemsize < 512) and (w * itemsize <= 2048)

    out_row_bytes = _round_up(out_w, 128) * itemsize
    in_row_bytes = _round_up(w, 128) * itemsize if narrow else 0
    p_blk, h_blk, num_pb, num_hb = _choose_blocks(
        n_planes, out_h, sublane, out_row_bytes + in_row_bytes,
        vmem_block_budget_bytes)

    kernel = functools.partial(
        _trim_kernel, top=top, left=left, p_blk=p_blk, h_blk=h_blk,
        out_w=out_w, out_h=out_h, n_planes=n_planes,
        num_pb=num_pb, num_hb=num_hb, narrow=narrow)

    scratch_shapes = [pltpu.SemaphoreType.DMA(())]
    if narrow:
        scratch_shapes = [pltpu.VMEM((p_blk, h_blk, w), img.dtype)] + scratch_shapes

    x3 = img.reshape(n_planes, h, w)    # free view: one block can span (N, C)

    out3 = pl.pallas_call(
        kernel,
        grid=(num_pb, num_hb),
        in_specs=[pl.BlockSpec(memory_space=pl.ANY)],      # stay in HBM; manual DMA
        out_specs=pl.BlockSpec((p_blk, h_blk, out_w),
                               lambda pb, hb: (pb, hb, 0)),
        out_shape=jax.ShapeDtypeStruct((n_planes, out_h, out_w), img.dtype),
        scratch_shapes=scratch_shapes,
        compiler_params=pltpu.CompilerParams(
            dimension_semantics=("parallel", "parallel"),
            vmem_limit_bytes=48 * 1024 * 1024,
        ),
    )(x3)

    return out3.reshape(n, c, out_h, out_w)


def _ref_trim(x, b):
    n, c, h, w = x.shape
    top = min(b, h)
    left = min(b, h)
    oh = max(0, h - 2 * b)
    ow = max(0, w - 2 * b)
    return x[:, :, top:top + oh, left:left + ow]


if __name__ == "__main__":
    root = jax.random.PRNGKey(0)
    k1, k2, k3, k4, k5 = jax.random.split(root, 5)

    # Case 1: spec-sized test (f32, square) -> narrow path, 2-step plane grid.
    x1 = jax.random.normal(k1, (2, 4, 16, 16), dtype=jnp.float32)
    y1 = jax.block_until_ready(trim_border(x1, 2))
    assert y1.shape == (2, 4, 12, 12), y1.shape
    assert jnp.array_equal(y1, _ref_trim(x1, 2)), "mismatch (f32 narrow)"

    # Case 2: bf16, non-square -> narrow path with a ragged plane tail.
    x2 = jax.random.normal(k2, (1, 3, 24, 20), dtype=jnp.float32).astype(jnp.bfloat16)
    y2 = jax.block_until_ready(trim_border(x2, 4))
    assert y2.shape == (1, 3, 16, 12), y2.shape
    assert jnp.array_equal(y2, _ref_trim(x2, 4)), "mismatch (bf16 narrow)"

    # Case 3: wide rows -> direct strided-DMA path, 2x2 grid (plane + row split).
    x3 = jax.random.normal(k3, (1, 2, 144, 152), dtype=jnp.float32)
    y3 = jax.block_until_ready(trim_border(x3, 8))
    assert y3.shape == (1, 2, 128, 136), y3.shape
    assert jnp.array_equal(y3, _ref_trim(x3, 8)), "mismatch (f32 wide)"

    # Case 4: wide rows with a ragged last row block (out_h=36, h_blk=24).
    x4 = jax.random.normal(k4, (1, 1, 40, 160), dtype=jnp.float32)
    y4 = jax.block_until_ready(trim_border(x4, 2))
    assert y4.shape == (1, 1, 36, 156), y4.shape
    assert jnp.array_equal(y4, _ref_trim(x4, 2)), "mismatch (f32 ragged rows)"

    # Case 5: border == 0 is a no-kernel identity.
    y5 = jax.block_until_ready(trim_border(x1, 0))
    assert jnp.array_equal(y5, x1), "border=0 should be identity"

    # Case 6: regression for timm's left=min(b, h) clamp with H < W and H < b:
    # collapses to an empty output, matching the reference.
    x6 = jax.random.normal(k5, (1, 1, 4, 32), dtype=jnp.float32)
    y6 = jax.block_until_ready(trim_border(x6, 10))
    assert y6.shape == _ref_trim(x6, 10).shape == (1, 1, 0, 12), y6.shape

    print("KERNEL_OK")
</pallas_src>

<mosaic_0001>
module attributes {stable_mosaic.version = 11 : i64} {
  func.func @_trim_kernel(%arg0: i32, %arg1: i32, %arg2: memref<8x16x16xf32, #tpu.memory_space<any>>, %arg3: memref<4x12x12xf32, #tpu.memory_space<vmem>>, %arg4: memref<4x12x16xf32, #tpu.memory_space<vmem>>, %arg5: memref<!tpu.dma_semaphore, #tpu.memory_space<semaphore_mem>>) attributes {dimension_semantics = [#tpu.dimension_semantics<parallel>, #tpu.dimension_semantics<parallel>], iteration_bounds = array<i64: 2, 1>, scalar_prefetch = 0 : i64, scratch_operands = 2 : i64, tpu.core_type = #tpu.core_type<tc>, window_params = [{}, {transform_indices = @transform_1, window_bounds = array<i64: 4, 12, 12>}]} {
    %c4_i32 = arith.constant 4 : i32
    %0 = arith.muli %arg0, %c4_i32 : i32
    %c12_i32 = arith.constant 12 : i32
    %1 = arith.muli %arg1, %c12_i32 : i32
    %c2_i32 = arith.constant 2 : i32
    %2 = arith.addi %c2_i32, %1 : i32
    %c0_i32 = arith.constant 0 : i32
    %3 = tpu.memref_slice %arg2[%0, %2, %c0_i32] : memref<8x16x16xf32, #tpu.memory_space<any>> -> memref<4x12x16xf32, #tpu.memory_space<any>>
    %c0_i32_0 = arith.constant 0 : i32
    %c0_i32_1 = arith.constant 0 : i32
    %c0_i32_2 = arith.constant 0 : i32
    %4 = tpu.memref_slice %arg4[%c0_i32_0, %c0_i32_1, %c0_i32_2] : memref<4x12x16xf32, #tpu.memory_space<vmem>> -> memref<4x12x16xf32, #tpu.memory_space<vmem>>
    tpu.enqueue_dma source(%3 : memref<4x12x16xf32, #tpu.memory_space<any>>) target(%4 : memref<4x12x16xf32, #tpu.memory_space<vmem>>) target_semaphore(%arg5 : memref<!tpu.dma_semaphore, #tpu.memory_space<semaphore_mem>>)
    %c0_i32_3 = arith.constant 0 : i32
    %5 = tpu.memref_slice %arg2[%0, %2, %c0_i32_3] : memref<8x16x16xf32, #tpu.memory_space<any>> -> memref<4x12x16xf32, #tpu.memory_space<any>>
    %c0_i32_4 = arith.constant 0 : i32
    %c0_i32_5 = arith.constant 0 : i32
    %c0_i32_6 = arith.constant 0 : i32
    %6 = tpu.memref_slice %arg4[%c0_i32_4, %c0_i32_5, %c0_i32_6] : memref<4x12x16xf32, #tpu.memory_space<vmem>> -> memref<4x12x16xf32, #tpu.memory_space<vmem>>
    tpu.wait_dma2 semaphore(%arg5 : memref<!tpu.dma_semaphore, #tpu.memory_space<semaphore_mem>>) src(%5 : memref<4x12x16xf32, #tpu.memory_space<any>>) dst(%6 : memref<4x12x16xf32, #tpu.memory_space<vmem>>)
    %c0 = arith.constant 0 : index
    %c0_7 = arith.constant 0 : index
    %c2 = arith.constant 2 : index
    %7 = vector.load %arg4[%c0, %c0_7, %c2] : memref<4x12x16xf32, #tpu.memory_space<vmem>>, vector<4x12x12xf32>
    %c0_8 = arith.constant 0 : index
    %c0_9 = arith.constant 0 : index
    %c0_10 = arith.constant 0 : index
    %8 = vector.load %arg3[%c0_8, %c0_9, %c0_10] : memref<4x12x12xf32, #tpu.memory_space<vmem>>, vector<4x12x12xf32>
    tpu.vector_store %arg3[%c0_8, %c0_9, %c0_10], %7 {strides = array<i32>} : memref<4x12x12xf32, #tpu.memory_space<vmem>>, vector<4x12x12xf32>,
    return
  }
  func.func @transform_1(%arg0: i32, %arg1: i32) -> (i32, i32, i32) {
    %c0_i32 = arith.constant 0 : i32
    %c0_i32_0 = arith.constant 0 : i32
    return %arg0, %arg1, %c0_i32 : i32, i32, i32
  }
}

</mosaic_0001>

<bundles_post_ra>
// kernel: tpu_custom_call.1
= control target key start
LH: loop header
LB: loop body
LE: loop exit
PB: predicated region body
PF: predicated region fallthrough
CT: control target
= control target key end

     0   :  { %s305_s6 = smov 0   ;;  %s307_s7 = smov 0   ;;  %s354_s0 = inlined_call_operand.hbm [shape: f32[8,16,16], index: 0, kind: input, shape index: {}]   ;;  %s355_s1 = inlined_call_operand.vmem [shape: f32[8,12,12], index: 1, kind: output, shape index: {}]  }
   0x1 LB: > { %s20_s8 = sadd.s32 1, %s285_s6  ;;  %p216_p1 = scmp.ge.s32.totalorder %s289_s7, 2  ;;  %s289_s7 = sphi %s307_s7, %s11_s7   ;;  %s285_s6 = sphi %s305_s6, %s356_s6  }
   0x2   : > { %p22_p0 = scmp.ge.s32.totalorder %s20_s8, 2  ;;  %s226_s9 = sshll.u32 (!%p216_p1), %s285_s6, 10 }
   0x3   : > { %48 = sbr.rel (%p216_p1) target bundleno = 160 (0xa0), region = 12  ;;  %s190_s12 = scalar_lea.hbm (!%p216_p1), %s354_s0, %s226_s9 }
   0x4   : > { %s358_s8 = smov (%p22_p0, %s20_s8), 0  ;;  %s319_s13 = scalar_lea.hbm (!%p216_p1), %s190_s12, 32 }
   0x5   : > { %s291_s14 = smov (!%p216_p1), [#allocation2]   ;;  %s282_s16 = sshll.u32 (!%p216_p1), %s285_s6, 6 }
   0x6   : > { %s81_s15 = sshll.u32 (!%p216_p1), %s291_s14, 4  ;;  %s324_s19 = scalar_lea.vmem (!%p216_p1), %s355_s1, %s282_s16  ;;  %s82_s15 = int_to_ptr.vmem [resolvable:$true] %s81_s15 }
   0x7   : > { %s271_s20 = scalar_lea.hbm (!%p216_p1), %s190_s12, 800  ;;  %s249_s23 = scalar_lea.hbm (!%p216_p1), %s354_s0, 2048 }
   0x8   : > { %p248_p2 = scmp.ne.s32.totalorder (!%p216_p1), %s319_s13, %s271_s20  ;;  %p250_p3 = scmp.lt.u32.totalorder (!%p216_p1), %s319_s13, %s354_s0 }
   0x9   : > { %p251_p4 = scmp.lt.u32.totalorder (!%p216_p1), %s249_s23, %s271_s20  ;;  %p253_p6 = scmp.lt.u32.totalorder (!%p216_p1), %s271_s20, %s319_s13 }
   0xb   : > { %p252_p5 = por %p251_p4, %p250_p3 }
   0xd   : > { %p254_p7 = por %p253_p6, %p252_p5 }
   0xf   : > { %p255_p8 = pnand %p254_p7, %p248_p2 }
  0x11   : > { %258 = shalt.err (!%p255_p8)  }
  0x12   : > { %s259_s26 = scalar_lea.vmem %s82_s15, 768  ;;  %s263_s27 = scalar_lea.vmem %s82_s15, 1024 }
  0x13   : > { %p260_p9 = scmp.ne.s32.totalorder %s82_s15, %s259_s26  ;;  %p264_p10 = scmp.lt.s32.totalorder %s82_s15, %s82_s15 }
  0x14   : > { %p265_p11 = scmp.lt.s32.totalorder %s263_s27, %s259_s26 }
  0x16   : > { %p266_p12 = por %p265_p11, %p264_p10 }
  0x18   : > { %p267_p13 = pnand %p266_p12, %p260_p9 }
  0x1a   : > { %270 = shalt.err (!%p267_p13)  }
  0x1b   : > { %s292_s28 = smov 256   ;;  %s293_s29 = smov 12  }
  0x1c   : > { %84 = dma.hbm_to_vmem [thread:$0]  %s319_s13, 768, %s82_s15, [#allocation3], %s292_s28, %s292_s28, %s293_s29 }
  0x1d   : > { %280 = dma.done.wait [#allocation3], 768 }
  0x1e   : > { %281 = vsyncadd [#allocation3], 4294966528  ;;  %v91_v0 = vld [vmem:[#allocation2 + $0x10] sm:$0xff]  ;;  %v89_v1 = vld [vmem:[#allocation2] sm:$0xff]  ;;  %s294_s30 = smov 126   ;;  %vm129_vm0 = vcmask 97280  }
  0x1f   : > { %109 = vrot.lane.b32.xlu1 %v91_v0, %s294_s30  ;;  %105 = vrot.lane.b32.xlu0 %v89_v1, %s294_s30  ;;  %v92_v2 = vld [vmem:[#allocation2 + $0x18] sm:$0xf]  ;;  %v90_v3 = vld [vmem:[#allocation2 + $0x8] sm:$0xf]  ;;  %v93_v5 = vld [vmem:[#allocation2 + $0x20] sm:$0xff]  ;;  %vm131_vm1 = vcmask 93184  }
  0x20   : > { %v94_v4 = vld [vmem:[#allocation2 + $0x28] sm:$0xf]  ;;  %v96_v6 = vld [vmem:[#allocation2 + $0x38] sm:$0xf]  ;;  %v95_v7 = vld [vmem:[#allocation2 + $0x30] sm:$0xff] }
  0x23   : > { %111 = vrot.lane.b32.xlu1 %v92_v2, %s294_s30  ;;  %107 = vrot.lane.b32.xlu0 %v90_v3, %s294_s30 }
  0x27   : > { %115 = vrot.lane.b32.xlu1 %v94_v4, %s294_s30  ;;  %113 = vrot.lane.b32.xlu0 %v93_v5, %s294_s30 }
  0x2b   : > { %119 = vrot.lane.b32.xlu1 %v96_v6, %s294_s30  ;;  %117 = vrot.lane.b32.xlu0 %v95_v7, %s294_s30 }
  0x91   : > { %v110_v8 = vpop.permute.xlu1 %109  ;;  %v106_v9 = vpop.permute.xlu0 %105 }
  0x92   : > { %130 = vst.msk [vmem:[%s324_s19] sm:$0xff] %vm129_vm0, %v106_v9  ;;  %133 = vst.msk [vmem:[%s324_s19 + $0x10] sm:$0xff] %vm129_vm0, %v110_v8 }
  0x95   : > { %v112_v10 = vpop.permute.xlu1 %111  ;;  %v108_v11 = vpop.permute.xlu0 %107 }
  0x96   : > { %132 = vst.msk [vmem:[%s324_s19 + $0x8] sm:$0xf] %vm131_vm1, %v108_v11  ;;  %134 = vst.msk [vmem:[%s324_s19 + $0x18] sm:$0xf] %vm131_vm1, %v112_v10 }
  0x99   : > { %v116_v12 = vpop.permute.xlu1 %115  ;;  %v114_v13 = vpop.permute.xlu0 %113 }
  0x9a   : > { %136 = vst.msk [vmem:[%s324_s19 + $0x28] sm:$0xf] %vm131_vm1, %v116_v12 }
  0x9b   : > { %135 = vst.msk [vmem:[%s324_s19 + $0x20] sm:$0xff] %vm129_vm0, %v114_v13 }
  0x9d   : > { %v120_v14 = vpop.permute.xlu1 %119  ;;  %v118_v15 = vpop.permute.xlu0 %117 }
  0x9e   : > { %138 = vst.msk [vmem:[%s324_s19 + $0x38] sm:$0xf] %vm131_vm1, %v120_v14 }
  0x9f   : > { %137 = vst.msk [vmem:[%s324_s19 + $0x30] sm:$0xff] %vm129_vm0, %v118_v15 }
  0xa0 PF: > { %s11_s7 = sadd.s32 1, %s289_s7   ;;  %s356_s6 = smov %s358_s8 }
  0xa1   : > { %p8_p0 = scmp.ge.s32.totalorder %s11_s7, 3  }
  0xa3   :  { %10 = sbr.rel (!%p8_p0) target bundleno = 1 (0x1), region = 40 }
  0xaa   :  { %172 = vsyncmov [#allocation3] }
  0xad   :  { %s173_s2 = vpop.sfrf %172 }
  0xae   :  { %p224_p1 = scmp.ne.s32.totalorder %s173_s2, 0 }
  0xb0   :  { %177 = shalt.err (%p224_p1)  }

</bundles_post_ra>
